<compile_context>
chip_gen: v7x
topology: tpu7x:2x2x1
jax: 0.10.0
libtpu: 0.0.40
codegen_flags: <defaults>
</compile_context>

<pallas_src>
import functools

import jax
import jax.numpy as jnp
from jax.experimental import pallas as pl
from jax.experimental.pallas import tpu as pltpu

INPUT_SIZE = 30
HIDDEN_SIZE = 40
NUM_CLASSES = 2


def mlp_kernel(x_ref, w1_ref, b1_ref, w2_ref, b2_ref, o_ref):
    # fc1: (TB, IN) @ (IN, HID) on the MXU, f32 accumulation, + bias row.
    h = jnp.dot(x_ref[...], w1_ref[...], preferred_element_type=jnp.float32)
    h = h + b1_ref[...]
    # exact sigmoid (exp + divide): EUP/VPU have enormous slack here.
    h = 1.0 / (1.0 + jnp.exp(-h))
    # fc2: (TB, HID) @ (HID, NC) + bias, narrow lane-count output tile.
    out = jnp.dot(h, w2_ref[...], preferred_element_type=jnp.float32)
    out = out + b2_ref[...]
    o_ref[...] = out.astype(o_ref.dtype)


def _round_up(n, m):
    return ((n + m - 1) // m) * m


@functools.partial(jax.jit, static_argnames=("tb",))
def net_forward(x, w1, b1, w2, b2, *, tb=2048):
    """Forward pass of Net: sigmoid(x @ w1 + b1) @ w2 + b2.

    x:  (B, INPUT_SIZE) f32
    w1: (INPUT_SIZE, HIDDEN_SIZE), b1: (1, HIDDEN_SIZE)
    w2: (HIDDEN_SIZE, NUM_CLASSES), b2: (1, NUM_CLASSES)
    returns (B, NUM_CLASSES) f32
    """
    B = x.shape[0]
    # Batch tile: multiple of 8 sublanes, capped so the grid has >= 2 tiles
    # whenever B > 8 (keeps both v7x TensorCores busy), and capped at `tb` so
    # double-buffered tiles stay under scoped-VMEM defaults on all generations.
    TB = max(8, min(tb, _round_up(pl.cdiv(B, 2), 8)))
    grid = (pl.cdiv(B, TB),)

    x = x.astype(jnp.float32)

    # TODO(synk): if x already arrives as bf16 end-to-end, keep it bf16 here
    # (with f32 accumulation) to halve the dominant HBM read stream.
    out = pl.pallas_call(
        mlp_kernel,
        out_shape=jax.ShapeDtypeStruct((B, NUM_CLASSES), jnp.float32),
        grid=grid,
        in_specs=[
            pl.BlockSpec((TB, INPUT_SIZE), lambda i: (i, 0)),           # batch-tiled stream
            pl.BlockSpec((INPUT_SIZE, HIDDEN_SIZE), lambda i: (0, 0)),  # VMEM-resident
            pl.BlockSpec((1, HIDDEN_SIZE), lambda i: (0, 0)),           # VMEM-resident
            pl.BlockSpec((HIDDEN_SIZE, NUM_CLASSES), lambda i: (0, 0)),  # VMEM-resident
            pl.BlockSpec((1, NUM_CLASSES), lambda i: (0, 0)),           # VMEM-resident
        ],
        out_specs=pl.BlockSpec((TB, NUM_CLASSES), lambda i: (i, 0)),    # narrow, unpadded
        compiler_params=pltpu.CompilerParams(
            dimension_semantics=("parallel",),   # shard batch tiles across TCs on v7x
        ),
    )(x, w1, b1, w2, b2)

    return out


def init_params(key):
    """Deterministic init mimicking nn.Linear's U(-1/sqrt(fan_in), 1/sqrt(fan_in))."""
    k1, k2, k3, k4 = jax.random.split(key, 4)
    lim1 = 1.0 / jnp.sqrt(jnp.float32(INPUT_SIZE))
    lim2 = 1.0 / jnp.sqrt(jnp.float32(HIDDEN_SIZE))
    # Stored pre-transposed relative to PyTorch's (out, in) convention.
    w1 = jax.random.uniform(k1, (INPUT_SIZE, HIDDEN_SIZE), jnp.float32, -lim1, lim1)
    b1 = jax.random.uniform(k2, (1, HIDDEN_SIZE), jnp.float32, -lim1, lim1)
    w2 = jax.random.uniform(k3, (HIDDEN_SIZE, NUM_CLASSES), jnp.float32, -lim2, lim2)
    b2 = jax.random.uniform(k4, (1, NUM_CLASSES), jnp.float32, -lim2, lim2)
    return w1, b1, w2, b2


def reference_forward(x, w1, b1, w2, b2):
    h = jax.nn.sigmoid(x @ w1 + b1)
    return h @ w2 + b2


if __name__ == "__main__":
    key = jax.random.PRNGKey(0)
    kx, kp, kx2 = jax.random.split(key, 3)
    w1, b1, w2, b2 = init_params(kp)

    # Small batch (single full tile).
    x = jax.random.normal(kx, (8, INPUT_SIZE), jnp.float32)
    out = jax.block_until_ready(net_forward(x, w1, b1, w2, b2))
    ref = reference_forward(x, w1, b1, w2, b2)
    assert out.shape == (8, NUM_CLASSES)
    assert jnp.allclose(out, ref, atol=1e-5, rtol=1e-5), float(jnp.max(jnp.abs(out - ref)))

    # Multi-tile path: B not a multiple of the tile -> exercises the partial
    # last block and the "parallel" grid axis.
    x2 = jax.random.normal(kx2, (300, INPUT_SIZE), jnp.float32)
    out2 = jax.block_until_ready(net_forward(x2, w1, b1, w2, b2, tb=128))
    ref2 = reference_forward(x2, w1, b1, w2, b2)
    assert out2.shape == (300, NUM_CLASSES)
    assert jnp.allclose(out2, ref2, atol=1e-5, rtol=1e-5), float(jnp.max(jnp.abs(out2 - ref2)))

    print("KERNEL_OK")
</pallas_src>

<mosaic_0001>
module attributes {stable_mosaic.version = 11 : i64} {
  func.func @mlp_kernel(%arg0: i32, %arg1: memref<8x30xf32, #tpu.memory_space<vmem>>, %arg2: memref<30x40xf32, #tpu.memory_space<vmem>>, %arg3: memref<1x40xf32, #tpu.memory_space<vmem>>, %arg4: memref<40x2xf32, #tpu.memory_space<vmem>>, %arg5: memref<1x2xf32, #tpu.memory_space<vmem>>, %arg6: memref<8x2xf32, #tpu.memory_space<vmem>>) attributes {dimension_semantics = [#tpu.dimension_semantics<parallel>], iteration_bounds = array<i64: 1>, scalar_prefetch = 0 : i64, scratch_operands = 0 : i64, tpu.core_type = #tpu.core_type<tc>, window_params = [{transform_indices = @transform_0, window_bounds = array<i64: 8, 30>}, {pipeline_mode = #tpu.pipeline_mode<synchronous>, transform_indices = @transform_1, window_bounds = array<i64: 30, 40>}, {pipeline_mode = #tpu.pipeline_mode<synchronous>, transform_indices = @transform_2, window_bounds = array<i64: 1, 40>}, {pipeline_mode = #tpu.pipeline_mode<synchronous>, transform_indices = @transform_3, window_bounds = array<i64: 40, 2>}, {pipeline_mode = #tpu.pipeline_mode<synchronous>, transform_indices = @transform_4, window_bounds = array<i64: 1, 2>}, {transform_indices = @transform_5, window_bounds = array<i64: 8, 2>}]} {
    %c0 = arith.constant 0 : index
    %c0_0 = arith.constant 0 : index
    %0 = vector.load %arg1[%c0, %c0_0] : memref<8x30xf32, #tpu.memory_space<vmem>>, vector<8x30xf32>
    %c0_1 = arith.constant 0 : index
    %c0_2 = arith.constant 0 : index
    %1 = vector.load %arg2[%c0_1, %c0_2] : memref<30x40xf32, #tpu.memory_space<vmem>>, vector<30x40xf32>
    %cst = arith.constant dense<0.000000e+00> : vector<8x40xf32>
    %2 = tpu.matmul %0, %1, %cst {dimension_numbers = #tpu.dot_dimension_numbers<[1], [0], [0], [1], [0, 0, 1, 1], [], []>} : vector<8x30xf32>, vector<30x40xf32>, vector<8x40xf32> -> vector<8x40xf32>
    %c0_3 = arith.constant 0 : index
    %c0_4 = arith.constant 0 : index
    %3 = vector.load %arg3[%c0_3, %c0_4] : memref<1x40xf32, #tpu.memory_space<vmem>>, vector<1x40xf32>
    %4 = vector.broadcast %3 : vector<1x40xf32> to vector<8x40xf32>
    %5 = arith.addf %2, %4 : vector<8x40xf32>
    %cst_5 = arith.constant 0.000000e+00 : f32
    %6 = vector.broadcast %cst_5 : f32 to vector<8x40xf32>
    %7 = arith.subf %6, %5 : vector<8x40xf32>
    %8 = math.exp %7 : vector<8x40xf32>
    %cst_6 = arith.constant 1.000000e+00 : f32
    %9 = vector.broadcast %cst_6 : f32 to vector<8x40xf32>
    %10 = arith.addf %9, %8 : vector<8x40xf32>
    %cst_7 = arith.constant 1.000000e+00 : f32
    %11 = vector.broadcast %cst_7 : f32 to vector<8x40xf32>
    %12 = arith.divf %11, %10 : vector<8x40xf32>
    %c0_8 = arith.constant 0 : index
    %c0_9 = arith.constant 0 : index
    %13 = vector.load %arg4[%c0_8, %c0_9] : memref<40x2xf32, #tpu.memory_space<vmem>>, vector<40x2xf32>
    %cst_10 = arith.constant dense<0.000000e+00> : vector<8x2xf32>
    %14 = tpu.matmul %12, %13, %cst_10 {dimension_numbers = #tpu.dot_dimension_numbers<[1], [0], [0], [1], [0, 0, 1, 1], [], []>} : vector<8x40xf32>, vector<40x2xf32>, vector<8x2xf32> -> vector<8x2xf32>
    %c0_11 = arith.constant 0 : index
    %c0_12 = arith.constant 0 : index
    %15 = vector.load %arg5[%c0_11, %c0_12] : memref<1x2xf32, #tpu.memory_space<vmem>>, vector<1x2xf32>
    %16 = vector.broadcast %15 : vector<1x2xf32> to vector<8x2xf32>
    %17 = arith.addf %14, %16 : vector<8x2xf32>
    %c0_13 = arith.constant 0 : index
    %c0_14 = arith.constant 0 : index
    %18 = vector.load %arg6[%c0_13, %c0_14] : memref<8x2xf32, #tpu.memory_space<vmem>>, vector<8x2xf32>
    tpu.vector_store %arg6[%c0_13, %c0_14], %17 {strides = array<i32>} : memref<8x2xf32, #tpu.memory_space<vmem>>, vector<8x2xf32>,
    return
  }
  func.func @transform_0(%arg0: i32) -> (i32, i32) {
    %c0_i32 = arith.constant 0 : i32
    %c0_i32_0 = arith.constant 0 : i32
    return %arg0, %c0_i32 : i32, i32
  }
  func.func @transform_1(%arg0: i32) -> (i32, i32) {
    %c0_i32 = arith.constant 0 : i32
    %c0_i32_0 = arith.constant 0 : i32
    %c0_i32_1 = arith.constant 0 : i32
    return %c0_i32, %c0_i32_0 : i32, i32
  }
  func.func @transform_2(%arg0: i32) -> (i32, i32) {
    %c0_i32 = arith.constant 0 : i32
    %c0_i32_0 = arith.constant 0 : i32
    %c0_i32_1 = arith.constant 0 : i32
    return %c0_i32, %c0_i32_0 : i32, i32
  }
  func.func @transform_3(%arg0: i32) -> (i32, i32) {
    %c0_i32 = arith.constant 0 : i32
    %c0_i32_0 = arith.constant 0 : i32
    %c0_i32_1 = arith.constant 0 : i32
    return %c0_i32, %c0_i32_0 : i32, i32
  }
  func.func @transform_4(%arg0: i32) -> (i32, i32) {
    %c0_i32 = arith.constant 0 : i32
    %c0_i32_0 = arith.constant 0 : i32
    %c0_i32_1 = arith.constant 0 : i32
    return %c0_i32, %c0_i32_0 : i32, i32
  }
  func.func @transform_5(%arg0: i32) -> (i32, i32) {
    %c0_i32 = arith.constant 0 : i32
    %c0_i32_0 = arith.constant 0 : i32
    return %arg0, %c0_i32 : i32, i32
  }
}

</mosaic_0001>

<bundles_post_ra>
// kernel: net_forward.1
= control target key start
LH: loop header
LB: loop body
LE: loop exit
PB: predicated region body
PF: predicated region fallthrough
CT: control target
= control target key end

     0   :  { %v269_v0 = vmov 0.0|0.0   ;;  %vm36_vm0 = vcmask 1045504   ;;  %vm270_vm1 = vmmov 0   ;;  %v271_v6 = vmov 0.0   ;;  %s342_s1 = inlined_call_operand.vmem [shape: f32[30,40], index: 1, kind: input, shape index: {}]   ;;  %s343_s0 = inlined_call_operand.vmem [shape: f32[8,30], index: 0, kind: input, shape index: {}]   ;;  %s344_s3 = inlined_call_operand.vmem [shape: f32[40,2], index: 3, kind: input, shape index: {}]   ;;  %s345_s2 = inlined_call_operand.vmem [shape: f32[1,40], index: 2, kind: input, shape index: {}]   ;;  %s346_s4 = inlined_call_operand.vmem [shape: f32[1,2], index: 4, kind: input, shape index: {}]   ;;  %s347_s5 = inlined_call_operand.vmem [shape: f32[8,2], index: 5, kind: output, shape index: {}]  }
   0x1   :  { %248 = vmatprep.subr.bf16.mxu0 %v269_v0  ;;  %v21_v1 = vld [vmem:[%s342_s1] sm:$0xff]  ;;  %v22_v2 = vld [vmem:[%s342_s1 + $0x8] sm:$0xff]  ;;  %v23_v3 = vld [vmem:[%s342_s1 + $0x10] sm:$0xff]  ;;  %255 = vmatprep.subr.bf16.mxu1 %v269_v0  ;;  %vm272_vm2 = vmmov 1   ;;  %vm32_vm4 = vcmask 244736   ;;  %vm128_vm5 = vcmask 326656  }
   0x2   :  { %v249_v4 = vpack.c.bf16 %v22_v2, %v21_v1  ;;  %v24_v5 = vld [vmem:[%s342_s1 + $0x18] sm:$0x3f]  ;;  %232 = vmatprep.mubr.msk.f32.mxu0 %vm270_vm1, %v271_v6  ;;  %245 = vmatprep.mubr.msk.f32.mxu1 %vm270_vm1, %v271_v6  ;;  %vm253_vm3 = vmpackc.low %vm36_vm0, %vm272_vm2  ;;  %v20_v8 = vld [vmem:[%s343_s0] sm:$0xff]  ;;  %vm202_vm6 = vcmask 15360  }
   0x3   :  { %v252_v7 = vpack.c.bf16 %v24_v5, %v23_v3  ;;  %v116_v9 = vld [vmem:[%s344_s3] sm:$0xff]  ;;  %v117_v10 = vld [vmem:[%s344_s3 + $0x8] sm:$0xff]  ;;  %v118_v12 = vld [vmem:[%s344_s3 + $0x10] sm:$0xff] }
   0x4   :  { %250 = vmatpush3.bf16.msra.mxu0 %v249_v4  ;;  %v256_v11 = vpack.c.bf16 %v117_v10, %v116_v9  ;;  %v119_v13 = vld [vmem:[%s344_s3 + $0x18] sm:$0xff]  ;;  %v120_v15 = vld [vmem:[%s344_s3 + $0x20] sm:$0xff] }
   0x5   :  { %251 = vmatprep.subr.bf16.mxu0 %v269_v0  ;;  %v259_v14 = vpack.c.bf16 %v119_v13, %v118_v12  ;;  %v208_v16 = vld [vmem:[%s345_s2] ss:$0 sm:$0xff] }
   0x6   :  { %257 = vmatpush3.bf16.msra.mxu1 %v256_v11  ;;  %v211_v25 = vld [vmem:[%s346_s4] ss:$0 sm:$0xff] }
   0x7   :  { %258 = vmatprep.subr.bf16.mxu1 %v269_v0 }
   0x8   :  { %254 = vmatpush3.bf16.msk.msra.mxu0 %vm253_vm3, %v252_v7 }
   0xa   :  { %260 = vmatpush3.bf16.msra.mxu1 %v259_v14 }
   0xb   :  { %233 = vmatmul.mubr.msk.f32.vlgmr.msra.gmra.mrb[0].mxu0 %vm32_vm4, %v20_v8  ;;  %243 = vmatprep.subr.mxu1 %v271_v6 }
   0xe   :  { %244 = vmatpush3.msra.mxu1 %v120_v15 }
  0xde   :  { %v106_v17 = vpop.f32.mrb[0].mxu0 }
  0xdf   :  { %v107_v18 = vadd.f32 %v208_v16, %v106_v17  ;;  %v234_v19 = vpop.f32.mrb[1].mxu0 }
  0xe1   :  { %v110_v20 = vsub.f32 0.0, %v107_v18 }
  0xe3   :  { %v111_v21 = vmul.f32 1.442695, %v110_v20 }
  0xe5   :  { %265 = vpow2.f32 %v111_v21 }
  0xef   :  { %v266_v22 = vpop.eup %265 }
  0xf0   :  { %v113_v23 = vadd.f32 1.0, %v266_v22 }
  0xf2   :  { %267 = vrcp.f32 %v113_v23 }
  0xfc   :  { %v268_v24 = vpop.eup %267 }
  0xfd   :  { %246 = vmatmul.mubr.msk.f32.vlgmr.msra.gmra.mrb[0].mxu1 %vm128_vm5, %v268_v24 }
 0x1d0   :  { %v198_v26 = vpop.f32.mrb[0].mxu1 }
 0x1d1   :  { %v199_v27 = vadd.f32 %v211_v25, %v198_v26  ;;  %v247_v28 = vpop.f32.mrb[1].mxu1 }
 0x1d3   :  { %203 = vst.msk [vmem:[%s347_s5] sm:$0xff] %vm202_vm6, %v199_v27 }

</bundles_post_ra>
